<compile_context>
chip_gen: v5e
topology: v5e:2x2
jax: 0.10.0
libtpu: 0.0.40
codegen_flags: <defaults>
</compile_context>

<pallas_src>
import functools

import jax
import jax.numpy as jnp
from jax.experimental import pallas as pl
from jax.experimental.pallas import tpu as pltpu

# --- model hyper-parameters (small, TPU-friendly) ---
BATCH = 8
C, HH, WW = 4, 8, 8
NUM_INPUTS = C * HH * WW          # 256
NUM_HIDDENS1 = 128
NUM_HIDDENS2 = 128
NUM_OUTPUTS = 16
NUM_OUT_PAD = 128                 # lane-dense padded output width
DROPOUT1 = 0.2
DROPOUT2 = 0.5
IS_TRAINING = True

_M_TILE_BF16 = 16                 # bf16 vreg sublane tile


def _dropout(h, bits_u32, rate):
    """Matches dropout_layer: keep iff rand > rate, scale kept by 1/(1-rate).

    Implemented as a single integer-threshold compare on raw uint32 bits plus
    one select (no uniform-float construction needed).
    """
    if rate <= 0.0:
        return h
    if rate >= 1.0:
        return jnp.zeros_like(h)
    thresh = jnp.uint32(int(rate * 4294967296.0))      # rate * 2**32
    keep = bits_u32 > thresh                           # P(keep) = 1 - rate
    return jnp.where(keep, h * (1.0 / (1.0 - rate)), 0.0)


def mlp_kernel(*refs, training):
    if training:
        (x_ref, w1_ref, b1_ref, w2_ref, b2_ref, w3_ref, b3_ref,
         r1_ref, r2_ref, o_ref) = refs
    else:
        (x_ref, w1_ref, b1_ref, w2_ref, b2_ref, w3_ref, b3_ref,
         o_ref) = refs

    x = x_ref[...]                                     # bf16 (M, NUM_INPUTS)

    # layer 1: relu(x @ W1 + b1)    (bf16 operands, f32 accumulate/epilogue)
    h1 = jnp.dot(x, w1_ref[...], preferred_element_type=jnp.float32) + b1_ref[...]
    h1 = jnp.maximum(h1, 0.0)
    if training:
        h1 = _dropout(h1, r1_ref[...], DROPOUT1)

    # layer 2: relu(h1 @ W2 + b2)
    h2 = jnp.dot(h1.astype(jnp.bfloat16), w2_ref[...],
                 preferred_element_type=jnp.float32) + b2_ref[...]
    h2 = jnp.maximum(h2, 0.0)
    if training:
        h2 = _dropout(h2, r2_ref[...], DROPOUT2)

    # layer 3 (no activation / no dropout), lane-padded output
    out = jnp.dot(h2.astype(jnp.bfloat16), w3_ref[...],
                  preferred_element_type=jnp.float32) + b3_ref[...]
    o_ref[...] = out.astype(o_ref.dtype)


def net_forward(x_nchw, params, seed, *, training=IS_TRAINING):
    w1, b1, w2, b2, w3, b3 = params
    b = x_nchw.shape[0]
    x2d = x_nchw.reshape(b, NUM_INPUTS).astype(jnp.float32)

    # pad batch rows to the bf16 sublane tile (16)
    m_pad = max(_M_TILE_BF16, ((b + _M_TILE_BF16 - 1) // _M_TILE_BF16) * _M_TILE_BF16)
    x_p = jnp.zeros((m_pad, NUM_INPUTS), jnp.float32).at[:b].set(x2d)

    # lane-pad the 16-wide output layer to 128 columns
    w3_p = jnp.zeros((NUM_HIDDENS2, NUM_OUT_PAD), jnp.float32).at[:, :NUM_OUTPUTS].set(w3)
    b3_p = jnp.zeros((1, NUM_OUT_PAD), jnp.float32).at[:, :NUM_OUTPUTS].set(b3)

    # bf16 operands for the MXU; biases stay f32
    x_bf = x_p.astype(jnp.bfloat16)
    w1_bf = w1.astype(jnp.bfloat16)
    w2_bf = w2.astype(jnp.bfloat16)
    w3_bf = w3_p.astype(jnp.bfloat16)

    vmem = lambda: pl.BlockSpec(memory_space=pltpu.MemorySpace.VMEM)
    inputs = [x_bf, w1_bf, b1, w2_bf, b2, w3_bf, b3_p]
    in_specs = [vmem() for _ in inputs]

    if training:
        # TODO(synk): on real TPU the in-kernel hardware PRNG
        # (pltpu.prng_seed/prng_random_bits) would avoid shipping these bits
        # through HBM, but it has no CPU/interpret lowering, so bits are
        # generated host-side and only the mask/select runs in-kernel.
        k1, k2 = jax.random.split(jax.random.PRNGKey(seed))
        r1 = jax.random.bits(k1, (m_pad, NUM_HIDDENS1), dtype=jnp.uint32)
        r2 = jax.random.bits(k2, (m_pad, NUM_HIDDENS2), dtype=jnp.uint32)
        inputs += [r1, r2]
        in_specs += [vmem(), vmem()]

    kernel = functools.partial(mlp_kernel, training=training)
    out_p = pl.pallas_call(
        kernel,
        out_shape=jax.ShapeDtypeStruct((m_pad, NUM_OUT_PAD), jnp.float32),
        in_specs=in_specs,
        out_specs=pl.BlockSpec(memory_space=pltpu.MemorySpace.VMEM),
    )(*inputs)

    return out_p[:b, :NUM_OUTPUTS]


def init_params(key):
    """Deterministic init mirroring nn.Linear shapes; stored as (in, out) + (1, out)."""
    ks = jax.random.split(key, 6)

    def linear(kw, kb, fan_in, fan_out):
        bound = 1.0 / jnp.sqrt(fan_in)
        w = jax.random.uniform(kw, (fan_in, fan_out), jnp.float32, -bound, bound)
        b = jax.random.uniform(kb, (1, fan_out), jnp.float32, -bound, bound)
        return w, b

    w1, b1 = linear(ks[0], ks[1], NUM_INPUTS, NUM_HIDDENS1)
    w2, b2 = linear(ks[2], ks[3], NUM_HIDDENS1, NUM_HIDDENS2)
    w3, b3 = linear(ks[4], ks[5], NUM_HIDDENS2, NUM_OUTPUTS)
    return (w1, b1, w2, b2, w3, b3)


if __name__ == "__main__":
    key = jax.random.PRNGKey(0)
    k_x, k_p = jax.random.split(key)

    x = jax.random.normal(k_x, (BATCH, C, HH, WW), dtype=jnp.float32)
    params = init_params(k_p)

    # training-mode run (with dropout)
    out = net_forward(x, params, seed=0, training=True)
    jax.block_until_ready(out)
    assert out.shape == (BATCH, NUM_OUTPUTS), out.shape
    assert out.dtype == jnp.float32
    assert bool(jnp.all(jnp.isfinite(out)))

    # eval-mode (no dropout) must match a plain-JAX bf16-operand reference
    out_eval = net_forward(x, params, seed=0, training=False)
    jax.block_until_ready(out_eval)

    w1, b1, w2, b2, w3, b3 = params
    x2d = x.reshape(BATCH, NUM_INPUTS)
    h1 = jnp.maximum(
        jnp.dot(x2d.astype(jnp.bfloat16), w1.astype(jnp.bfloat16),
                preferred_element_type=jnp.float32) + b1, 0.0)
    h2 = jnp.maximum(
        jnp.dot(h1.astype(jnp.bfloat16), w2.astype(jnp.bfloat16),
                preferred_element_type=jnp.float32) + b2, 0.0)
    ref = jnp.dot(h2.astype(jnp.bfloat16), w3.astype(jnp.bfloat16),
                  preferred_element_type=jnp.float32) + b3
    assert jnp.allclose(out_eval, ref, atol=1e-2, rtol=1e-2), \
        float(jnp.max(jnp.abs(out_eval - ref)))

    print("KERNEL_OK")
</pallas_src>

<mosaic_0001>
module attributes {stable_mosaic.version = 11 : i64} {
  func.func @mlp_kernel(%arg0: memref<16x256xbf16, #tpu.memory_space<vmem>>, %arg1: memref<256x128xbf16, #tpu.memory_space<vmem>>, %arg2: memref<1x128xf32, #tpu.memory_space<vmem>>, %arg3: memref<128x128xbf16, #tpu.memory_space<vmem>>, %arg4: memref<1x128xf32, #tpu.memory_space<vmem>>, %arg5: memref<128x128xbf16, #tpu.memory_space<vmem>>, %arg6: memref<1x128xf32, #tpu.memory_space<vmem>>, %arg7: memref<16x128xi32, #tpu.memory_space<vmem>>, %arg8: memref<16x128xi32, #tpu.memory_space<vmem>>, %arg9: memref<16x128xf32, #tpu.memory_space<vmem>>) attributes {dimension_semantics = [], scalar_prefetch = 0 : i64, scratch_operands = 0 : i64, tpu.core_type = #tpu.core_type<tc>} {
    %c0 = arith.constant 0 : index
    %c0_0 = arith.constant 0 : index
    %0 = vector.load %arg0[%c0, %c0_0] : memref<16x256xbf16, #tpu.memory_space<vmem>>, vector<16x256xbf16>
    %c0_1 = arith.constant 0 : index
    %c0_2 = arith.constant 0 : index
    %1 = vector.load %arg1[%c0_1, %c0_2] : memref<256x128xbf16, #tpu.memory_space<vmem>>, vector<256x128xbf16>
    %cst = arith.constant dense<0.000000e+00> : vector<16x128xf32>
    %2 = tpu.matmul %0, %1, %cst {dimension_numbers = #tpu.dot_dimension_numbers<[1], [0], [0], [1], [0, 0, 1, 1], [], []>} : vector<16x256xbf16>, vector<256x128xbf16>, vector<16x128xf32> -> vector<16x128xf32>
    %c0_3 = arith.constant 0 : index
    %c0_4 = arith.constant 0 : index
    %3 = vector.load %arg2[%c0_3, %c0_4] : memref<1x128xf32, #tpu.memory_space<vmem>>, vector<1x128xf32>
    %4 = vector.broadcast %3 : vector<1x128xf32> to vector<16x128xf32>
    %5 = arith.addf %2, %4 : vector<16x128xf32>
    %cst_5 = arith.constant 0.000000e+00 : f32
    %6 = vector.broadcast %cst_5 : f32 to vector<16x128xf32>
    %7 = arith.maximumf %5, %6 : vector<16x128xf32>
    %c0_6 = arith.constant 0 : index
    %c0_7 = arith.constant 0 : index
    %8 = vector.load %arg7[%c0_6, %c0_7] : memref<16x128xi32, #tpu.memory_space<vmem>>, vector<16x128xi32>
    %c858993459_i32 = arith.constant 858993459 : i32
    %9 = vector.broadcast %c858993459_i32 : i32 to vector<16x128xi32>
    %10 = arith.cmpi ugt, %8, %9 : vector<16x128xi32>
    %cst_8 = arith.constant 1.250000e+00 : f32
    %11 = vector.broadcast %cst_8 : f32 to vector<16x128xf32>
    %12 = arith.mulf %7, %11 : vector<16x128xf32>
    %cst_9 = arith.constant 0.000000e+00 : f32
    %13 = vector.broadcast %cst_9 : f32 to vector<16x128xf32>
    %14 = arith.select %10, %12, %13 : vector<16x128xi1>, vector<16x128xf32>
    %15 = arith.truncf %14 : vector<16x128xf32> to vector<16x128xbf16>
    %c0_10 = arith.constant 0 : index
    %c0_11 = arith.constant 0 : index
    %16 = vector.load %arg3[%c0_10, %c0_11] : memref<128x128xbf16, #tpu.memory_space<vmem>>, vector<128x128xbf16>
    %cst_12 = arith.constant dense<0.000000e+00> : vector<16x128xf32>
    %17 = tpu.matmul %15, %16, %cst_12 {dimension_numbers = #tpu.dot_dimension_numbers<[1], [0], [0], [1], [0, 0, 1, 1], [], []>} : vector<16x128xbf16>, vector<128x128xbf16>, vector<16x128xf32> -> vector<16x128xf32>
    %c0_13 = arith.constant 0 : index
    %c0_14 = arith.constant 0 : index
    %18 = vector.load %arg4[%c0_13, %c0_14] : memref<1x128xf32, #tpu.memory_space<vmem>>, vector<1x128xf32>
    %19 = vector.broadcast %18 : vector<1x128xf32> to vector<16x128xf32>
    %20 = arith.addf %17, %19 : vector<16x128xf32>
    %cst_15 = arith.constant 0.000000e+00 : f32
    %21 = vector.broadcast %cst_15 : f32 to vector<16x128xf32>
    %22 = arith.maximumf %20, %21 : vector<16x128xf32>
    %c0_16 = arith.constant 0 : index
    %c0_17 = arith.constant 0 : index
    %23 = vector.load %arg8[%c0_16, %c0_17] : memref<16x128xi32, #tpu.memory_space<vmem>>, vector<16x128xi32>
    %c-2147483648_i32 = arith.constant -2147483648 : i32
    %24 = vector.broadcast %c-2147483648_i32 : i32 to vector<16x128xi32>
    %25 = arith.cmpi ugt, %23, %24 : vector<16x128xi32>
    %cst_18 = arith.constant 2.000000e+00 : f32
    %26 = vector.broadcast %cst_18 : f32 to vector<16x128xf32>
    %27 = arith.mulf %22, %26 : vector<16x128xf32>
    %cst_19 = arith.constant 0.000000e+00 : f32
    %28 = vector.broadcast %cst_19 : f32 to vector<16x128xf32>
    %29 = arith.select %25, %27, %28 : vector<16x128xi1>, vector<16x128xf32>
    %30 = arith.truncf %29 : vector<16x128xf32> to vector<16x128xbf16>
    %c0_20 = arith.constant 0 : index
    %c0_21 = arith.constant 0 : index
    %31 = vector.load %arg5[%c0_20, %c0_21] : memref<128x128xbf16, #tpu.memory_space<vmem>>, vector<128x128xbf16>
    %cst_22 = arith.constant dense<0.000000e+00> : vector<16x128xf32>
    %32 = tpu.matmul %30, %31, %cst_22 {dimension_numbers = #tpu.dot_dimension_numbers<[1], [0], [0], [1], [0, 0, 1, 1], [], []>} : vector<16x128xbf16>, vector<128x128xbf16>, vector<16x128xf32> -> vector<16x128xf32>
    %c0_23 = arith.constant 0 : index
    %c0_24 = arith.constant 0 : index
    %33 = vector.load %arg6[%c0_23, %c0_24] : memref<1x128xf32, #tpu.memory_space<vmem>>, vector<1x128xf32>
    %34 = vector.broadcast %33 : vector<1x128xf32> to vector<16x128xf32>
    %35 = arith.addf %32, %34 : vector<16x128xf32>
    %c0_25 = arith.constant 0 : index
    %c0_26 = arith.constant 0 : index
    %36 = vector.load %arg9[%c0_25, %c0_26] : memref<16x128xf32, #tpu.memory_space<vmem>>, vector<16x128xf32>
    tpu.vector_store %arg9[%c0_25, %c0_26], %35 {strides = array<i32>} : memref<16x128xf32, #tpu.memory_space<vmem>>, vector<16x128xf32>,
    return
  }
}

</mosaic_0001>

<bundles_post_ra>
// kernel: tpu_custom_call.1
= control target key start
LH: loop header
LB: loop body
LE: loop exit
PB: predicated region body
PF: predicated region fallthrough
CT: control target
= control target key end

     0   :  { %14 = vsyncpa [#allocation3], 0  ;;  %s992_s0 = inlined_call_operand.hbm [shape: bf16[16,256], index: 0, kind: input, shape index: {}]   ;;  %s993_s1 = inlined_call_operand.hbm [shape: bf16[256,128], index: 1, kind: input, shape index: {}]   ;;  %s994_s2 = inlined_call_operand.vmem [shape: f32[1,128], index: 2, kind: input, shape index: {}]   ;;  %s995_s3 = inlined_call_operand.hbm [shape: bf16[128,128], index: 3, kind: input, shape index: {}]   ;;  %s996_s4 = inlined_call_operand.vmem [shape: f32[1,128], index: 4, kind: input, shape index: {}]   ;;  %s997_s5 = inlined_call_operand.hbm [shape: bf16[128,128], index: 5, kind: input, shape index: {}]   ;;  %s998_s6 = inlined_call_operand.vmem [shape: f32[1,128], index: 6, kind: input, shape index: {}]   ;;  %s999_s7 = inlined_call_operand.hbm [shape: u32[16,128], index: 7, kind: input, shape index: {}]   ;;  %s1000_s8 = inlined_call_operand.hbm [shape: u32[16,128], index: 8, kind: input, shape index: {}]   ;;  %s1001_s9 = inlined_call_operand.hbm [shape: f32[16,128], index: 9, kind: output, shape index: {}]  }
   0x1   :  { %15 = vsyncpa [#allocation6], 0 }
   0x2   :  { %16 = vsyncpa [#allocation9], 0 }
   0x3   :  { %17 = vsyncpa [#allocation12], 0  ;;  %s36_s11 = sshll.u32 %s993_s1, 4  ;;  %s37_s11 = int_to_ptr.hbm [resolvable:$true] %s36_s11 }
   0x4   :  { %18 = vsyncpa [#allocation4], 0  ;;  %s889_s12 = smov [#allocation5]   ;;  %s66_s16 = sshll.u32 %s997_s5, 4  ;;  %s67_s16 = int_to_ptr.hbm [resolvable:$true] %s66_s16 }
   0x5   :  { %s38_s13 = sshll.u32 %s889_s12, 4  ;;  %s890_s17 = smov 64   ;;  %s39_s13 = int_to_ptr.vmem [resolvable:$true] %s38_s13 }
   0x6   :  { %s891_s18 = smov 4   ;;  %s892_s19 = smov [#allocation8]  }
   0x7   :  { %44 = dma.hbm_to_vmem [thread:$0]  %s37_s11, 2048, %s39_s13, [#allocation6], %s890_s17, %s890_s17, %s891_s18  }
   0x8   :  { %s68_s20 = sshll.u32 %s892_s19, 4  ;;  %s23_s23 = sshll.u32 %s992_s0, 4  ;;  %s69_s20 = int_to_ptr.vmem [resolvable:$true] %s68_s20  ;;  %s24_s23 = int_to_ptr.hbm [resolvable:$true] %s23_s23 }
   0x9   :  { %74 = dma.hbm_to_vmem [thread:$0]  %s67_s16, 1024, %s69_s20, [#allocation9], %s890_s17, %s890_s17, %s891_s18  }
   0xa   :  { %s893_s1 = smov [#allocation2]   ;;  %s51_s5 = sshll.u32 %s995_s3, 4  ;;  %s52_s5 = int_to_ptr.hbm [resolvable:$true] %s51_s5 }
   0xb   :  { %s25_s24 = sshll.u32 %s893_s1, 4  ;;  %s894_s27 = smov 128   ;;  %s26_s24 = int_to_ptr.vmem [resolvable:$true] %s25_s24 }
   0xc   :  { %s895_s28 = smov 8   ;;  %s896_s29 = smov [#allocation7]  }
   0xd   :  { %31 = dma.hbm_to_vmem [thread:$0]  %s24_s23, 256, %s26_s24, [#allocation3], %s894_s27, %s894_s27, %s895_s28  }
   0xe   :  { %s53_s30 = sshll.u32 %s896_s29, 4  ;;  %s81_s11 = sshll.u32 %s999_s7, 4  ;;  %s54_s30 = int_to_ptr.vmem [resolvable:$true] %s53_s30  ;;  %s82_s11 = int_to_ptr.hbm [resolvable:$true] %s81_s11 }
   0xf   :  { %59 = dma.hbm_to_vmem [thread:$0]  %s52_s5, 1024, %s54_s30, [#allocation6], %s890_s17, %s890_s17, %s891_s18  }
  0x10   :  { %s94_s3 = sshll.u32 %s1000_s8, 4  ;;  %s897_s14 = smov [#allocation10]   ;;  %s95_s3 = int_to_ptr.hbm [resolvable:$true] %s94_s3 }
  0x11   :  { %s83_s15 = sshll.u32 %s897_s14, 4  ;;  %s898_s16 = smov [#allocation11]   ;;  %s84_s15 = int_to_ptr.vmem [resolvable:$true] %s83_s15 }
  0x12   :  { %89 = dma.hbm_to_vmem [thread:$0]  %s82_s11, 256, %s84_s15, [#allocation9], %s894_s27, %s894_s27, %s895_s28  }
  0x13   :  { %s96_s19 = sshll.u32 %s898_s16, 4  ;;  %s97_s19 = int_to_ptr.vmem [resolvable:$true] %s96_s19 }
  0x14   :  { %102 = dma.hbm_to_vmem [thread:$0]  %s95_s3, 256, %s97_s19, [#allocation12], %s894_s27, %s894_s27, %s895_s28  }
  0x15   :  { %879 = dma.done.wait [#allocation3], 256  }
  0x16   :  { %880 = vsyncadd [#allocation3], 4294967040 }
  0x17   :  { %881 = dma.done.wait [#allocation6], 3072  }
  0x18   :  { %882 = vsyncadd [#allocation6], 4294964224 }
  0x19   :  { %883 = dma.done.wait [#allocation9], 1280  }
  0x1a   :  { %884 = vsyncadd [#allocation9], 4294966016 }
  0x1b   :  { %885 = dma.done.wait [#allocation12], 256  }
  0x1c   :  { %886 = vsyncadd [#allocation12], 4294967040  ;;  %v672_v0 = vld [vmem:[#allocation5 + $0x38] sm:$0xff]  ;;  %v671_v2 = vld [vmem:[#allocation5 + $0x30] sm:$0xff]  ;;  %s501_s1 = sshll.u32 %s1001_s9, 4  ;;  %s502_s1 = int_to_ptr.hbm [resolvable:$true] %s501_s1 }
  0x1d   :  { %v680_v1 = vld [vmem:[#allocation5 + $0x78] sm:$0xff]  ;;  %271 = vmatpush.bf16.msra.mxu0 %v672_v0  ;;  %v679_v3 = vld [vmem:[#allocation5 + $0x70] sm:$0xff]  ;;  %v670_v4 = vld [vmem:[#allocation5 + $0x28] sm:$0xff] }
  0x1e   :  { %285 = vmatpush.bf16.msra.mxu1 %v680_v1  ;;  %v678_v5 = vld [vmem:[#allocation5 + $0x68] sm:$0xff]  ;;  %v688_v6 = vld [vmem:[#allocation7 + $0x38] sm:$0xff]  ;;  %v687_v7 = vld [vmem:[#allocation7 + $0x30] sm:$0xff] }
  0x1f   :  { %382 = vmatpush.bf16.msra.mxu2 %v688_v6  ;;  %v669_v8 = vld [vmem:[#allocation5 + $0x20] sm:$0xff]  ;;  %v686_v10 = vld [vmem:[#allocation7 + $0x28] sm:$0xff]  ;;  %v668_v11 = vld [vmem:[#allocation5 + $0x18] sm:$0xff] }
  0x20   :  { %v677_v9 = vld [vmem:[#allocation5 + $0x60] sm:$0xff]  ;;  %v676_v12 = vld [vmem:[#allocation5 + $0x58] sm:$0xff]  ;;  %v667_v13 = vld [vmem:[#allocation5 + $0x10] sm:$0xff] }
  0x21   :  { %272 = vmatpush.bf16.msra.mxu0 %v671_v2  ;;  %v675_v14 = vld [vmem:[#allocation5 + $0x50] sm:$0xff]  ;;  %v666_v15 = vld [vmem:[#allocation5 + $0x8] sm:$0xff]  ;;  %v665_v17 = vld [vmem:[#allocation5] sm:$0xff] }
  0x22   :  { %286 = vmatpush.bf16.msra.mxu1 %v679_v3  ;;  %v674_v16 = vld [vmem:[#allocation5 + $0x48] sm:$0xff]  ;;  %v673_v18 = vld [vmem:[#allocation5 + $0x40] sm:$0xff]  ;;  %v519_v19 = vld [vmem:[#allocation2] sm:$0xf] }
  0x23   :  { %383 = vmatpush.bf16.msra.mxu2 %v687_v7  ;;  %v664_v20 = vld [vmem:[#allocation2 + $0x4] sm:$0xf0]  ;;  %v663_v21 = vld [vmem:[#allocation2 + $0x4] sm:$0xf]  ;;  %v521_v22 = vld [vmem:[#allocation2 + $0x8] sm:$0xf0] }
  0x24   :  { %v520_v23 = vor.u32 %v664_v20, %v519_v19  ;;  %v524_v24 = vor.u32 %v663_v21, %v521_v22  ;;  %v685_v25 = vld [vmem:[#allocation7 + $0x20] sm:$0xff]  ;;  %v684_v26 = vld [vmem:[#allocation7 + $0x18] sm:$0xff]  ;;  %v683_v27 = vld [vmem:[#allocation7 + $0x10] sm:$0xff] }
  0x25   :  { %273 = vmatpush.bf16.msra.mxu0 %v670_v4  ;;  %v682_v28 = vld [vmem:[#allocation7 + $0x8] sm:$0xff]  ;;  %v681_v29 = vld [vmem:[#allocation7] sm:$0xff]  ;;  %v696_v30 = vld [vmem:[#allocation8 + $0x38] sm:$0xff] }
  0x26   :  { %287 = vmatpush.bf16.msra.mxu1 %v678_v5  ;;  %479 = vmatpush.bf16.msra.mxu3 %v696_v30  ;;  %v695_v31 = vld [vmem:[#allocation8 + $0x30] sm:$0xff]  ;;  %v694_v32 = vld [vmem:[#allocation8 + $0x28] sm:$0xff]  ;;  %v693_v33 = vld [vmem:[#allocation8 + $0x20] sm:$0xff] }
  0x27   :  { %384 = vmatpush.bf16.msra.mxu2 %v686_v10  ;;  %v708_v34 = vld [vmem:[%s994_s2] ss:$0 sm:$0xff]  ;;  %v301_v38 = vld [vmem:[#allocation10] sm:$0xff]  ;;  %v302_v39 = vld [vmem:[#allocation10 + $0x8] sm:$0xff] }
  0x28   :  { %v589_v43 = vxor.u32 2147483648, %v301_v38  ;;  %v590_v44 = vxor.u32 2147483648, %v302_v39  ;;  %v692_v52 = vld [vmem:[#allocation8 + $0x18] sm:$0xff]  ;;  %v691_v53 = vld [vmem:[#allocation8 + $0x10] sm:$0xff]  ;;  %v690_v54 = vld [vmem:[#allocation8 + $0x8] sm:$0xff] }
  0x29   :  { %274 = vmatpush.bf16.msra.mxu0 %v669_v8  ;;  %v689_v55 = vld [vmem:[#allocation8] sm:$0xff]  ;;  %v709_v57 = vld [vmem:[%s996_s4] ss:$0 sm:$0xff]  ;;  %v399_v59 = vld [vmem:[#allocation11 + $0x8] sm:$0xff]  ;;  %s899_s4 = smov [#allocation13]  }
  0x2a   :  { %288 = vmatpush.bf16.msra.mxu1 %v677_v9  ;;  %480 = vmatpush.bf16.msra.mxu3 %v695_v31  ;;  %vm305_vm0 = vcmp.gt.s32.totalorder %v589_v43, 3006477107  ;;  %vm308_vm1 = vcmp.gt.s32.totalorder %v590_v44, 3006477107  ;;  %v398_v58 = vld [vmem:[#allocation11] sm:$0xff]  ;;  %v627_v62 = vxor.u32 2147483648, %v399_v59 }
  0x2b   :  { %385 = vmatpush.bf16.msra.mxu2 %v685_v25  ;;  %vm623_vm2 = vmpackc.low %vm308_vm1, %vm305_vm0  ;;  %v626_v61 = vxor.u32 2147483648, %v398_v58  ;;  %v710_v6 = vld [vmem:[%s998_s6] ss:$0 sm:$0xff]  ;;  %s499_s21 = sshll.u32 %s899_s4, 4  ;;  %s500_s21 = int_to_ptr.vmem [resolvable:$true] %s499_s21 }
  0x2c   :  { %vm405_vm4 = vcmp.gt.s32.totalorder %v627_v62, 0 }
  0x2d   :  { %275 = vmatpush.bf16.msra.mxu0 %v668_v11  ;;  %vm402_vm3 = vcmp.gt.s32.totalorder %v626_v61, 0 }
  0x2e   :  { %289 = vmatpush.bf16.msra.mxu1 %v676_v12  ;;  %481 = vmatpush.bf16.msra.mxu3 %v694_v32  ;;  %vm660_vm5 = vmpackc.low %vm405_vm4, %vm402_vm3 }
  0x2f   :  { %386 = vmatpush.bf16.msra.mxu2 %v684_v26 }
  0x31   :  { %276 = vmatpush.bf16.msra.mxu0 %v667_v13 }
  0x32   :  { %290 = vmatpush.bf16.msra.mxu1 %v675_v14  ;;  %482 = vmatpush.bf16.msra.mxu3 %v693_v33 }
  0x33   :  { %387 = vmatpush.bf16.msra.mxu2 %v683_v27 }
  0x35   :  { %277 = vmatpush.bf16.msra.mxu0 %v666_v15 }
  0x36   :  { %291 = vmatpush.bf16.msra.mxu1 %v674_v16  ;;  %483 = vmatpush.bf16.msra.mxu3 %v692_v52 }
  0x37   :  { %388 = vmatpush.bf16.msra.mxu2 %v682_v28 }
  0x39   :  { %278 = vmatpush.bf16.msra.mxu0 %v665_v17 }
  0x3a   :  { %292 = vmatpush.bf16.msra.mxu1 %v673_v18  ;;  %484 = vmatpush.bf16.msra.mxu3 %v691_v53 }
  0x3b   :  { %389 = vmatpush.bf16.msra.mxu2 %v681_v29 }
  0x3c   :  { %279 = vmatmul.bf16.vlgmr.msra.gmra.mxu0 %v520_v23 }
  0x3d   :  { %293 = vmatmul.bf16.vlgmr.msra.gmra.mxu1 %v524_v24 }
  0x3e   :  { %485 = vmatpush.bf16.msra.mxu3 %v690_v54 }
  0x42   :  { %486 = vmatpush.bf16.msra.mxu3 %v689_v55 }
  0xb9   :  { %v280_v35 = vpop.f32.mrf.mxu0 }
  0xba   :  { %v294_v36 = vpop.f32.mrf.mxu1  ;;  %v281_v37 = vadd.f32 %v708_v34, %v280_v35 }
  0xbc   :  { %v295_v40 = vadd.f32 %v294_v36, %v281_v37 }
  0xbe   :  { %v299_v46 = vmax.f32 %v295_v40, 0.0 }
  0xc0   :  { %v309_v49 = vmul.f32 1.25, %v299_v46 }
  0xc1   :  { %v282_v41 = vpop.f32.mrf.mxu0 }
  0xc2   :  { %v283_v42 = vadd.f32 %v708_v34, %v282_v41  ;;  %v296_v45 = vpop.f32.mrf.mxu1 }
  0xc4   :  { %v297_v47 = vadd.f32 %v296_v45, %v283_v42 }
  0xc6   :  { %v300_v48 = vmax.f32 %v297_v47, 0.0 }
  0xc8   :  { %v310_v50 = vmul.f32 1.25, %v300_v48 }
  0xca   :  { %v624_v51 = vpack.c.bf16 %v310_v50, %v309_v49 }
  0xcc   :  { %625 = vmatmul.msk.bf16.vlgmr.msra.gmra.mxu2 %vm623_vm2, %v624_v51 }
 0x14f   :  { %v391_v56 = vpop.f32.mrf.mxu2 }
 0x150   :  { %v392_v60 = vadd.f32 %v709_v57, %v391_v56 }
 0x152   :  { %v396_v0 = vmax.f32 %v392_v60, 0.0 }
 0x154   :  { %v406_v3 = vmul.f32 2.0, %v396_v0 }
 0x157   :  { %v393_v63 = vpop.f32.mrf.mxu2 }
 0x158   :  { %v394_v1 = vadd.f32 %v709_v57, %v393_v63 }
 0x15a   :  { %v397_v2 = vmax.f32 %v394_v1, 0.0 }
 0x15c   :  { %v407_v4 = vmul.f32 2.0, %v397_v2 }
 0x15e   :  { %v661_v5 = vpack.c.bf16 %v407_v4, %v406_v3 }
 0x160   :  { %662 = vmatmul.msk.bf16.vlgmr.msra.gmra.mxu3 %vm660_vm5, %v661_v5 }
 0x1e3   :  { %v488_v7 = vpop.f32.mrf.mxu3 }
 0x1e4   :  { %v489_v8 = vadd.f32 %v710_v6, %v488_v7 }
 0x1e6   :  { %493 = vst [vmem:[#allocation13] sm:$0xff] %v489_v8 }
 0x1eb   :  { %v490_v9 = vpop.f32.mrf.mxu3 }
 0x1ec   :  { %v491_v10 = vadd.f32 %v710_v6, %v490_v9 }
 0x1ee   :  { %494 = vst [vmem:[#allocation13 + $0x8] sm:$0xff] %v491_v10 }
 0x1ef   :  { %507 = dma.vmem_to_hbm [thread:$0]  %s500_s21, 256, %s502_s1, [#allocation4], %s894_s27, %s894_s27, %s895_s28  }
 0x1f0   :  { %887 = dma.done.wait [#allocation4], 256  }
 0x1f1   :  { %888 = vsyncadd [#allocation4], 4294967040 }
 0x1f2   :  { %512 = vsyncpa [#allocation3], 1 }
 0x1f3   :  { %513 = vsyncpa [#allocation6], 1 }
 0x1f4   :  { %514 = vsyncpa [#allocation9], 1 }
 0x1f5   :  { %515 = vsyncpa [#allocation12], 1 }
 0x1f6   :  { %516 = vsyncpa [#allocation4], 1 }

</bundles_post_ra>
